<compile_context>
chip_gen: v7x
topology: tpu7x:2x2x1
jax: 0.10.0
libtpu: 0.0.40
codegen_flags: <defaults>
</compile_context>

<pallas_src>
import numpy as np
import jax
import jax.numpy as jnp
from jax.experimental import pallas as pl
from jax.experimental.pallas import tpu as pltpu


def _scat_kernel(xre_ref, xim_ref, psi_ref, c_ref, s_ref, out_ref,
                 acc_re, acc_im):
    """Grid = (filter blocks, output-column tiles, K tiles of the IDFT contraction).

    xre_ref/xim_ref : (B, N)        spectrum halves, fully resident (K-sliced here)
    psi_ref         : (F_BLK, TK)   K-slice of the real filter block
    c_ref / s_ref   : (TK, TN)      cos / sin IDFT tiles (1/N folded in)
    out_ref         : (B, F_BLK, TN)  |ifft(fft(x) * psi)| for this tile
    acc_*           : (B*F_BLK, TN) f32 accumulators carried across the K axis
    """
    k = pl.program_id(2)

    @pl.when(k == 0)
    def _():
        acc_re[...] = jnp.zeros_like(acc_re)
        acc_im[...] = jnp.zeros_like(acc_im)

    b = xre_ref.shape[0]
    f_blk, tk = psi_ref.shape

    # Aligned K-window of the resident spectrum (offset is a multiple of tk,
    # itself a multiple of 128).
    off = pl.multiple_of(k * tk, tk)
    xre = xre_ref[:, pl.ds(off, tk)]
    xim = xim_ref[:, pl.ds(off, tk)]

    psi = psi_ref[...]
    cdt = c_ref.dtype
    # cdgmm with a real filter (B.shape[-1] == 1 branch): broadcast multiply,
    # with the (batch, filter) pairs flattened into the matmul M dimension.
    yre = (xre[:, None, :] * psi[None, :, :]).reshape(b * f_blk, tk).astype(cdt)
    yim = (xim[:, None, :] * psi[None, :, :]).reshape(b * f_blk, tk).astype(cdt)

    c = c_ref[...]
    s = s_ref[...]
    # Complex inverse DFT with deduplicated twiddles (each C/S tile reused by
    # both accumulators):  z_re = y_re @ C - y_im @ S ; z_im = y_re @ S + y_im @ C
    acc_re[...] += (jnp.dot(yre, c, preferred_element_type=jnp.float32)
                    - jnp.dot(yim, s, preferred_element_type=jnp.float32))
    acc_im[...] += (jnp.dot(yre, s, preferred_element_type=jnp.float32)
                    + jnp.dot(yim, c, preferred_element_type=jnp.float32))

    @pl.when(k == pl.num_programs(2) - 1)
    def _():
        zr = acc_re[...]
        zi = acc_im[...]
        # ModulusStable.forward: sqrt(re^2 + im^2).
        out_ref[...] = jnp.sqrt(zr * zr + zi * zi).reshape(out_ref.shape)


def _pick_tile(n, target):
    """Largest multiple-of-128 divisor of n that is <= target (or n itself)."""
    if n <= target:
        return n
    t = target
    while t > 128 and n % t != 0:
        t -= 128
    return t if n % t == 0 else n


def wavelet_scat_forward(x, psi, pad_left, pad_right, ind_start, ind_end,
                         *, f_blk=128, tk=512, tn=512,
                         compute_dtype=jnp.float32,
                         vmem_limit_bytes=32 * 1024 * 1024):
    """x: (B, 1, n_samples) float32; psi: (F, N_pad) real frequency filters.

    Returns (B, F, ind_end - ind_start) first-order scattering activations,
    matching the PyTorch module's (batch, out_channels, n_samples_out) layout.
    `compute_dtype=jnp.bfloat16` halves the twiddle/filtered-spectrum stream
    (v6e/v7x bandwidth lever) while accumulation stays f32.
    """
    b, _, n_samples = x.shape
    sig = x.reshape(b, n_samples)

    # U_0 = F.pad(x, (pad_left, pad_right), mode='reflect')
    x_pad = jnp.pad(sig, ((0, 0), (pad_left, pad_right)), mode="reflect")
    n_pad = x_pad.shape[-1]
    f = psi.shape[0]

    # Forward FFT hoisted out of the kernel (computed once, not per filter).
    x_hat = jnp.fft.fft(x_pad.astype(jnp.complex64), axis=-1)
    x_re = jnp.real(x_hat).astype(jnp.float32)                     # (B, N)
    x_im = jnp.imag(x_hat).astype(jnp.float32)                     # (B, N)

    # Filter block sized to fill the MXU M dimension (b * f_blk rows), but
    # never beyond the 8-rounded filter count (avoids zero-padded blocks).
    f_blk = min(f_blk, pl.cdiv(f, 8) * 8)
    f_pad = pl.cdiv(f, f_blk) * f_blk
    psi_p = jnp.pad(psi.astype(jnp.float32), ((0, f_pad - f), (0, 0)))   # (F_pad, N)

    # Deduplicated IDFT twiddles (host constants), 1/N normalization folded in.
    idx = np.arange(n_pad)
    ang = (2.0 * np.pi / n_pad) * ((idx[:, None] * idx[None, :]) % n_pad)
    c_mat = jnp.asarray(np.cos(ang) / n_pad, dtype=compute_dtype)   # (N, N)
    s_mat = jnp.asarray(np.sin(ang) / n_pad, dtype=compute_dtype)   # (N, N)

    # Tile the contraction (K) and output-column (N) axes so the twiddle
    # working set stays bounded (required for v7x's 64 MiB VMEM at large N).
    tk = _pick_tile(n_pad, tk)
    tn = _pick_tile(n_pad, tn)

    num_fb = f_pad // f_blk
    num_nb = n_pad // tn
    num_kb = n_pad // tk

    out = pl.pallas_call(
        _scat_kernel,
        out_shape=jax.ShapeDtypeStruct((b, f_pad, n_pad), jnp.float32),
        grid_spec=pltpu.PrefetchScalarGridSpec(
            num_scalar_prefetch=0,
            grid=(num_fb, num_nb, num_kb),
            in_specs=[
                pl.BlockSpec((b, n_pad), lambda i, n, k: (0, 0)),     # Re(X), resident
                pl.BlockSpec((b, n_pad), lambda i, n, k: (0, 0)),     # Im(X), resident
                pl.BlockSpec((f_blk, tk), lambda i, n, k: (i, k)),    # filter K-slice
                pl.BlockSpec((tk, tn), lambda i, n, k: (k, n)),       # cos twiddles
                pl.BlockSpec((tk, tn), lambda i, n, k: (k, n)),       # sin twiddles
            ],
            out_specs=pl.BlockSpec((b, f_blk, tn), lambda i, n, k: (0, i, n)),
            scratch_shapes=[
                pltpu.VMEM((b * f_blk, tn), jnp.float32),             # Re accumulator
                pltpu.VMEM((b * f_blk, tn), jnp.float32),             # Im accumulator
            ],
        ),
        compiler_params=pltpu.CompilerParams(
            # filter-block and output-column axes are independent -> megacore
            # parallel; the K (contraction) axis carries the accumulators.
            dimension_semantics=("parallel", "parallel", "arbitrary"),
            # Plenty for the default tiles (~7 MiB working set); raise to
            # ~96 MiB on v6e when using larger tk/tn per the tuning notes.
            vmem_limit_bytes=vmem_limit_bytes,
        ),
    )(x_re, x_im, psi_p, c_mat, s_mat)

    # unpad (first_scat_features = U_1_m[..., ind_start[0]:ind_end[0]])
    # and drop zero-padded filters.
    return out[:, :f, ind_start:ind_end]


def make_filters(n_filters, n_pad):
    """Deterministic synthetic first-order filterbank of shape (F, N_pad)."""
    freqs = np.arange(n_pad, dtype=np.float32) / n_pad
    xis = np.linspace(0.05, 0.45, n_filters, dtype=np.float32)
    sigmas = xis / 5.0 + 0.01
    psi = np.exp(-((freqs[None, :] - xis[:, None]) ** 2)
                 / (2.0 * (sigmas[:, None] ** 2)))
    return jnp.asarray(psi, dtype=jnp.float32)


if __name__ == "__main__":
    batch = 2
    n_samples = 128       # "shape" of the scattering transform (small config)
    n_filters = 8         # number of first-order psi filters
    n_pad = 256           # padded length (power of two, as in ScatteringBase1D)
    pad_left = (n_pad - n_samples) // 2
    pad_right = n_pad - n_samples - pad_left
    ind_start, ind_end = pad_left, pad_left + n_samples   # ind_start[0]:ind_end[0]

    key = jax.random.PRNGKey(0)
    x = jax.random.normal(key, (batch, 1, n_samples), dtype=jnp.float32)
    psi = make_filters(n_filters, n_pad)

    feats = wavelet_scat_forward(x, psi, pad_left, pad_right, ind_start, ind_end)
    feats = jax.block_until_ready(feats)

    # Reference (plain JAX FFT/IFFT) for a correctness check.
    sig = x.reshape(batch, n_samples)
    x_pad = jnp.pad(sig, ((0, 0), (pad_left, pad_right)), mode="reflect")
    u0_hat = jnp.fft.fft(x_pad.astype(jnp.complex64), axis=-1)
    u1 = u0_hat[:, None, :] * psi[None, :, :].astype(jnp.complex64)
    u1m = jnp.abs(jnp.fft.ifft(u1, axis=-1))
    ref = np.asarray(u1m[:, :, ind_start:ind_end])

    assert feats.shape == (batch, n_filters, n_samples), feats.shape
    np.testing.assert_allclose(np.asarray(feats), ref, rtol=5e-3, atol=5e-3)

    # Demonstrate the bf16 twiddle / filtered-spectrum fast path (f32 accumulation).
    feats_bf16 = wavelet_scat_forward(x, psi, pad_left, pad_right,
                                      ind_start, ind_end,
                                      compute_dtype=jnp.bfloat16)
    feats_bf16 = jax.block_until_ready(feats_bf16)
    np.testing.assert_allclose(np.asarray(feats_bf16), ref, rtol=5e-2, atol=3e-2)

    print("KERNEL_OK")
</pallas_src>

<mosaic_0001>
module attributes {stable_mosaic.version = 11 : i64} {
  func.func @_scat_kernel(%arg0: i32, %arg1: i32, %arg2: i32, %arg3: memref<2x256xf32, #tpu.memory_space<vmem>>, %arg4: memref<2x256xf32, #tpu.memory_space<vmem>>, %arg5: memref<8x256xf32, #tpu.memory_space<vmem>>, %arg6: memref<256x256xf32, #tpu.memory_space<vmem>>, %arg7: memref<256x256xf32, #tpu.memory_space<vmem>>, %arg8: memref<2x8x256xf32, #tpu.memory_space<vmem>>, %arg9: memref<16x256xf32, #tpu.memory_space<vmem>>, %arg10: memref<16x256xf32, #tpu.memory_space<vmem>>) attributes {dimension_semantics = [#tpu.dimension_semantics<parallel>, #tpu.dimension_semantics<parallel>, #tpu.dimension_semantics<arbitrary>], iteration_bounds = array<i64: 1, 1, 1>, scalar_prefetch = 0 : i64, scratch_operands = 2 : i64, tpu.core_type = #tpu.core_type<tc>, window_params = [{pipeline_mode = #tpu.pipeline_mode<synchronous>, transform_indices = @transform_0, window_bounds = array<i64: 2, 256>}, {pipeline_mode = #tpu.pipeline_mode<synchronous>, transform_indices = @transform_1, window_bounds = array<i64: 2, 256>}, {transform_indices = @transform_2, window_bounds = array<i64: 8, 256>}, {transform_indices = @transform_3, window_bounds = array<i64: 256, 256>}, {transform_indices = @transform_4, window_bounds = array<i64: 256, 256>}, {transform_indices = @transform_5, window_bounds = array<i64: 2, 8, 256>}]} {
    %c0_i32 = arith.constant 0 : i32
    %0 = arith.cmpi eq, %arg2, %c0_i32 : i32
    %1 = arith.extui %0 : i1 to i32
    %c0_i32_0 = arith.constant 0 : i32
    %2 = arith.cmpi ne, %1, %c0_i32_0 : i32
    scf.if %2 {
      %cst_21 = arith.constant 0.000000e+00 : f32
      %39 = vector.broadcast %cst_21 : f32 to vector<16x256xf32>
      %c0_22 = arith.constant 0 : index
      %c0_23 = arith.constant 0 : index
      %40 = vector.load %arg9[%c0_22, %c0_23] : memref<16x256xf32, #tpu.memory_space<vmem>>, vector<16x256xf32>
      tpu.vector_store %arg9[%c0_22, %c0_23], %39 {strides = array<i32>} : memref<16x256xf32, #tpu.memory_space<vmem>>, vector<16x256xf32>,
      %cst_24 = arith.constant 0.000000e+00 : f32
      %41 = vector.broadcast %cst_24 : f32 to vector<16x256xf32>
      %c0_25 = arith.constant 0 : index
      %c0_26 = arith.constant 0 : index
      %42 = vector.load %arg10[%c0_25, %c0_26] : memref<16x256xf32, #tpu.memory_space<vmem>>, vector<16x256xf32>
      tpu.vector_store %arg10[%c0_25, %c0_26], %41 {strides = array<i32>} : memref<16x256xf32, #tpu.memory_space<vmem>>, vector<16x256xf32>,
    } else {
    }
    %c256_i32 = arith.constant 256 : i32
    %3 = arith.muli %arg2, %c256_i32 : i32
    %4 = tpu.assume_multiple %3, 256 : i32
    %c0 = arith.constant 0 : index
    %5 = arith.index_cast %4 : i32 to index
    %6 = vector.load %arg3[%c0, %5] : memref<2x256xf32, #tpu.memory_space<vmem>>, vector<2x256xf32>
    %c0_1 = arith.constant 0 : index
    %7 = arith.index_cast %4 : i32 to index
    %8 = vector.load %arg4[%c0_1, %7] : memref<2x256xf32, #tpu.memory_space<vmem>>, vector<2x256xf32>
    %c0_2 = arith.constant 0 : index
    %c0_3 = arith.constant 0 : index
    %9 = vector.load %arg5[%c0_2, %c0_3] : memref<8x256xf32, #tpu.memory_space<vmem>>, vector<8x256xf32>
    %10 = vector.shape_cast %6 : vector<2x256xf32> to vector<2x1x256xf32>
    %11 = vector.shape_cast %9 : vector<8x256xf32> to vector<1x8x256xf32>
    %12 = vector.broadcast %10 : vector<2x1x256xf32> to vector<2x8x256xf32>
    %13 = vector.broadcast %11 : vector<1x8x256xf32> to vector<2x8x256xf32>
    %14 = arith.mulf %12, %13 : vector<2x8x256xf32>
    %15 = vector.shape_cast %14 : vector<2x8x256xf32> to vector<16x256xf32>
    %16 = vector.shape_cast %8 : vector<2x256xf32> to vector<2x1x256xf32>
    %17 = vector.shape_cast %9 : vector<8x256xf32> to vector<1x8x256xf32>
    %18 = vector.broadcast %16 : vector<2x1x256xf32> to vector<2x8x256xf32>
    %19 = vector.broadcast %17 : vector<1x8x256xf32> to vector<2x8x256xf32>
    %20 = arith.mulf %18, %19 : vector<2x8x256xf32>
    %21 = vector.shape_cast %20 : vector<2x8x256xf32> to vector<16x256xf32>
    %c0_4 = arith.constant 0 : index
    %c0_5 = arith.constant 0 : index
    %22 = vector.load %arg6[%c0_4, %c0_5] : memref<256x256xf32, #tpu.memory_space<vmem>>, vector<256x256xf32>
    %c0_6 = arith.constant 0 : index
    %c0_7 = arith.constant 0 : index
    %23 = vector.load %arg7[%c0_6, %c0_7] : memref<256x256xf32, #tpu.memory_space<vmem>>, vector<256x256xf32>
    %c0_8 = arith.constant 0 : index
    %c0_9 = arith.constant 0 : index
    %24 = vector.load %arg9[%c0_8, %c0_9] : memref<16x256xf32, #tpu.memory_space<vmem>>, vector<16x256xf32>
    %cst = arith.constant dense<0.000000e+00> : vector<16x256xf32>
    %25 = tpu.matmul %15, %22, %cst {dimension_numbers = #tpu.dot_dimension_numbers<[1], [0], [0], [1], [0, 0, 1, 1], [], []>} : vector<16x256xf32>, vector<256x256xf32>, vector<16x256xf32> -> vector<16x256xf32>
    %cst_10 = arith.constant dense<0.000000e+00> : vector<16x256xf32>
    %26 = tpu.matmul %21, %23, %cst_10 {dimension_numbers = #tpu.dot_dimension_numbers<[1], [0], [0], [1], [0, 0, 1, 1], [], []>} : vector<16x256xf32>, vector<256x256xf32>, vector<16x256xf32> -> vector<16x256xf32>
    %27 = arith.subf %25, %26 : vector<16x256xf32>
    %28 = arith.addf %24, %27 : vector<16x256xf32>
    %c0_11 = arith.constant 0 : index
    %c0_12 = arith.constant 0 : index
    %29 = vector.load %arg9[%c0_11, %c0_12] : memref<16x256xf32, #tpu.memory_space<vmem>>, vector<16x256xf32>
    tpu.vector_store %arg9[%c0_11, %c0_12], %28 {strides = array<i32>} : memref<16x256xf32, #tpu.memory_space<vmem>>, vector<16x256xf32>,
    %c0_13 = arith.constant 0 : index
    %c0_14 = arith.constant 0 : index
    %30 = vector.load %arg10[%c0_13, %c0_14] : memref<16x256xf32, #tpu.memory_space<vmem>>, vector<16x256xf32>
    %cst_15 = arith.constant dense<0.000000e+00> : vector<16x256xf32>
    %31 = tpu.matmul %15, %23, %cst_15 {dimension_numbers = #tpu.dot_dimension_numbers<[1], [0], [0], [1], [0, 0, 1, 1], [], []>} : vector<16x256xf32>, vector<256x256xf32>, vector<16x256xf32> -> vector<16x256xf32>
    %cst_16 = arith.constant dense<0.000000e+00> : vector<16x256xf32>
    %32 = tpu.matmul %21, %22, %cst_16 {dimension_numbers = #tpu.dot_dimension_numbers<[1], [0], [0], [1], [0, 0, 1, 1], [], []>} : vector<16x256xf32>, vector<256x256xf32>, vector<16x256xf32> -> vector<16x256xf32>
    %33 = arith.addf %31, %32 : vector<16x256xf32>
    %34 = arith.addf %30, %33 : vector<16x256xf32>
    %c0_17 = arith.constant 0 : index
    %c0_18 = arith.constant 0 : index
    %35 = vector.load %arg10[%c0_17, %c0_18] : memref<16x256xf32, #tpu.memory_space<vmem>>, vector<16x256xf32>
    tpu.vector_store %arg10[%c0_17, %c0_18], %34 {strides = array<i32>} : memref<16x256xf32, #tpu.memory_space<vmem>>, vector<16x256xf32>,
    %c0_i32_19 = arith.constant 0 : i32
    %36 = arith.cmpi eq, %arg2, %c0_i32_19 : i32
    %37 = arith.extui %36 : i1 to i32
    %c0_i32_20 = arith.constant 0 : i32
    %38 = arith.cmpi ne, %37, %c0_i32_20 : i32
    scf.if %38 {
      %c0_21 = arith.constant 0 : index
      %c0_22 = arith.constant 0 : index
      %39 = vector.load %arg9[%c0_21, %c0_22] : memref<16x256xf32, #tpu.memory_space<vmem>>, vector<16x256xf32>
      %c0_23 = arith.constant 0 : index
      %c0_24 = arith.constant 0 : index
      %40 = vector.load %arg10[%c0_23, %c0_24] : memref<16x256xf32, #tpu.memory_space<vmem>>, vector<16x256xf32>
      %41 = arith.mulf %39, %39 : vector<16x256xf32>
      %42 = arith.mulf %40, %40 : vector<16x256xf32>
      %43 = arith.addf %41, %42 : vector<16x256xf32>
      %44 = math.sqrt %43 : vector<16x256xf32>
      %45 = vector.shape_cast %44 : vector<16x256xf32> to vector<2x8x256xf32>
      %c0_25 = arith.constant 0 : index
      %c0_26 = arith.constant 0 : index
      %c0_27 = arith.constant 0 : index
      %46 = vector.load %arg8[%c0_25, %c0_26, %c0_27] : memref<2x8x256xf32, #tpu.memory_space<vmem>>, vector<2x8x256xf32>
      tpu.vector_store %arg8[%c0_25, %c0_26, %c0_27], %45 {strides = array<i32>} : memref<2x8x256xf32, #tpu.memory_space<vmem>>, vector<2x8x256xf32>,
    } else {
    }
    return
  }
  func.func @transform_0(%arg0: i32, %arg1: i32, %arg2: i32) -> (i32, i32) {
    %c0_i32 = arith.constant 0 : i32
    %c0_i32_0 = arith.constant 0 : i32
    %c0_i32_1 = arith.constant 0 : i32
    return %c0_i32, %c0_i32_0 : i32, i32
  }
  func.func @transform_1(%arg0: i32, %arg1: i32, %arg2: i32) -> (i32, i32) {
    %c0_i32 = arith.constant 0 : i32
    %c0_i32_0 = arith.constant 0 : i32
    %c0_i32_1 = arith.constant 0 : i32
    return %c0_i32, %c0_i32_0 : i32, i32
  }
  func.func @transform_2(%arg0: i32, %arg1: i32, %arg2: i32) -> (i32, i32) {
    %c0_i32 = arith.constant 0 : i32
    return %arg0, %arg2 : i32, i32
  }
  func.func @transform_3(%arg0: i32, %arg1: i32, %arg2: i32) -> (i32, i32) {
    %c0_i32 = arith.constant 0 : i32
    return %arg2, %arg1 : i32, i32
  }
  func.func @transform_4(%arg0: i32, %arg1: i32, %arg2: i32) -> (i32, i32) {
    %c0_i32 = arith.constant 0 : i32
    return %arg2, %arg1 : i32, i32
  }
  func.func @transform_5(%arg0: i32, %arg1: i32, %arg2: i32) -> (i32, i32, i32) {
    %c0_i32 = arith.constant 0 : i32
    %c0_i32_0 = arith.constant 0 : i32
    return %c0_i32, %arg0, %arg1 : i32, i32, i32
  }
}

</mosaic_0001>

<bundles_post_ra>
// kernel: tpu_custom_call.1
= control target key start
LH: loop header
LB: loop body
LE: loop exit
PB: predicated region body
PF: predicated region fallthrough
CT: control target
= control target key end

     0   :  { %10 = vsyncpa [#allocation5], 0  ;;  %s1318_s0 = inlined_call_operand.hbm [shape: f32[2,256], index: 0, kind: input, shape index: {}]   ;;  %s1319_s1 = inlined_call_operand.hbm [shape: f32[2,256], index: 1, kind: input, shape index: {}]   ;;  %s1320_s2 = inlined_call_operand.hbm [shape: f32[8,256], index: 2, kind: input, shape index: {}]   ;;  %s1321_s3 = inlined_call_operand.hbm [shape: f32[256,256], index: 3, kind: input, shape index: {}]   ;;  %s1322_s4 = inlined_call_operand.hbm [shape: f32[256,256], index: 4, kind: input, shape index: {}]   ;;  %s1323_s5 = inlined_call_operand.hbm [shape: f32[2,8,256], index: 5, kind: output, shape index: {}]  }
   0x1   :  { %11 = vsyncpa [#allocation8], 0 }
   0x2   :  { %12 = vsyncpa [#allocation11], 0 }
   0x3   :  { %13 = vsyncpa [#allocation6], 0  ;;  %s1132_s18 = smov [#allocation7]   ;;  %s1133_s20 = smov [#allocation10]  }
   0x4   :  { %s30_s19 = sshll.u32 %s1132_s18, 4  ;;  %s49_s21 = sshll.u32 %s1133_s20, 4  ;;  %s31_s19 = int_to_ptr.vmem [resolvable:$true] %s30_s19  ;;  %s1170_s21 = int_to_ptr.vmem [resolvable:$true] %s49_s21 }
   0x5   :  { %s992_s24 = scalar_lea.hbm %s1319_s1, 64 }
   0x6   :  { %p993_p0 = scmp.ne.s32.totalorder %s1319_s1, %s992_s24  ;;  %p996_p1 = scmp.lt.u32.totalorder %s992_s24, %s1319_s1 }
   0x8   :  { %p998_p2 = pnand %p996_p1, %p993_p0 }
   0xa   :  { %1001 = shalt.err (!%p998_p2)
}
   0xb   :  { %s1002_s29 = scalar_lea.vmem %s31_s19, 64  ;;  %p1007_p4 = scmp.lt.s32.totalorder %s31_s19, %s31_s19 }
   0xc   :  { %p1003_p3 = scmp.ne.s32.totalorder %s31_s19, %s1002_s29  ;;  %p1008_p5 = scmp.lt.s32.totalorder %s1002_s29, %s1002_s29 }
   0xe   :  { %p1009_p6 = por %p1008_p5, %p1007_p4 }
  0x10   :  { %p1010_p7 = pnand %p1009_p6, %p1003_p3 }
  0x12   :  { %1013 = shalt.err (!%p1010_p7)
}
  0x13   :  { %33 = dma.hbm_to_vmem [thread:$0]  %s1319_s1, 64, %s31_s19, [#allocation8]  }
  0x14   :  { %s1014_s9 = scalar_lea.hbm %s1321_s3, 8192 }
  0x15   :  { %p1015_p8 = scmp.ne.s32.totalorder %s1321_s3, %s1014_s9  ;;  %p1018_p9 = scmp.lt.u32.totalorder %s1014_s9, %s1321_s3 }
  0x17   :  { %p1020_p10 = pnand %p1018_p9, %p1015_p8 }
  0x19   :  { %1023 = shalt.err (!%p1020_p10)
}
  0x1a   :  { %s1024_s14 = scalar_lea.vmem %s1170_s21, 8192  ;;  %p1029_p12 = scmp.lt.s32.totalorder %s1170_s21, %s1170_s21 }
  0x1b   :  { %p1025_p11 = scmp.ne.s32.totalorder %s1170_s21, %s1024_s14  ;;  %p1030_p13 = scmp.lt.s32.totalorder %s1024_s14, %s1024_s14 }
  0x1d   :  { %p1031_p0 = por %p1030_p13, %p1029_p12 }
  0x1f   :  { %p1032_p1 = pnand %p1031_p0, %p1025_p11 }
  0x21   :  { %1035 = shalt.err (!%p1032_p1)
}
  0x22   :  { %s1134_s1 = smov 256   ;;  %s1135_s15 = smov 16  }
  0x23   :  { %55 = dma.hbm_to_vmem [thread:$0]  %s1321_s3, 8192, %s1170_s21, [#allocation11], %s1134_s1, %s1134_s1, %s1135_s15  }
  0x24   :  { %s1136_s18 = smov [#allocation4]   ;;  %s1137_s20 = smov [#allocation9]  }
  0x25   :  { %s20_s19 = sshll.u32 %s1136_s18, 4  ;;  %s40_s22 = sshll.u32 %s1137_s20, 4  ;;  %s21_s19 = int_to_ptr.vmem [resolvable:$true] %s20_s19  ;;  %s41_s22 = int_to_ptr.vmem [resolvable:$true] %s40_s22 }
  0x26   :  { %s1036_s25 = scalar_lea.hbm %s1318_s0, 64 }
  0x27   :  { %p1037_p2 = scmp.ne.s32.totalorder %s1318_s0, %s1036_s25  ;;  %p1040_p3 = scmp.lt.u32.totalorder %s1036_s25, %s1318_s0 }
  0x29   :  { %p1042_p4 = pnand %p1040_p3, %p1037_p2 }
  0x2b   :  { %1045 = shalt.err (!%p1042_p4)
}
  0x2c   :  { %s1046_s3 = scalar_lea.vmem %s21_s19, 64  ;;  %p1051_p6 = scmp.lt.s32.totalorder %s21_s19, %s21_s19 }
  0x2d   :  { %p1047_p5 = scmp.ne.s32.totalorder %s21_s19, %s1046_s3  ;;  %p1052_p7 = scmp.lt.s32.totalorder %s1046_s3, %s1046_s3 }
  0x2f   :  { %p1053_p8 = por %p1052_p7, %p1051_p6 }
  0x31   :  { %p1054_p9 = pnand %p1053_p8, %p1047_p5 }
  0x33   :  { %1057 = shalt.err (!%p1054_p9)
}
  0x34   :  { %23 = dma.hbm_to_vmem [thread:$0]  %s1318_s0, 64, %s21_s19, [#allocation5]  }
  0x35   :  { %s1058_s8 = scalar_lea.hbm %s1320_s2, 256 }
  0x36   :  { %p1059_p10 = scmp.ne.s32.totalorder %s1320_s2, %s1058_s8  ;;  %p1062_p11 = scmp.lt.u32.totalorder %s1058_s8, %s1320_s2 }
  0x38   :  { %p1064_p12 = pnand %p1062_p11, %p1059_p10 }
  0x3a   :  { %1067 = shalt.err (!%p1064_p12)
}
  0x3b   :  { %s1068_s13 = scalar_lea.vmem %s41_s22, 256  ;;  %p1073_p0 = scmp.lt.s32.totalorder %s41_s22, %s41_s22 }
  0x3c   :  { %p1069_p13 = scmp.ne.s32.totalorder %s41_s22, %s1068_s13  ;;  %p1074_p1 = scmp.lt.s32.totalorder %s1068_s13, %s1068_s13 }
  0x3e   :  { %p1075_p2 = por %p1074_p1, %p1073_p0 }
  0x40   :  { %p1076_p3 = pnand %p1075_p2, %p1069_p13 }
  0x42   :  { %1079 = shalt.err (!%p1076_p3)
}
  0x43   :  { %43 = dma.hbm_to_vmem [thread:$0]  %s1320_s2, 256, %s41_s22, [#allocation8]  }
  0x44   :  { %s1138_s16 = smov [#allocation12]   ;;  %s1080_s20 = scalar_lea.hbm %s1322_s4, 8192 }
  0x45   :  { %s61_s17 = sshll.u32 %s1138_s16, 4  ;;  %p1081_p4 = scmp.ne.s32.totalorder %s1322_s4, %s1080_s20  ;;  %s62_s17 = int_to_ptr.vmem [resolvable:$true] %s61_s17 }
  0x46   :  { %p1084_p5 = scmp.lt.u32.totalorder %s1080_s20, %s1322_s4 }
  0x48   :  { %p1086_p6 = pnand %p1084_p5, %p1081_p4 }
  0x4a   :  { %1089 = shalt.err (!%p1086_p6)
}
  0x4b   :  { %s1090_s27 = scalar_lea.vmem %s62_s17, 8192  ;;  %p1095_p8 = scmp.lt.s32.totalorder %s62_s17, %s62_s17 }
  0x4c   :  { %p1091_p7 = scmp.ne.s32.totalorder %s62_s17, %s1090_s27  ;;  %p1096_p9 = scmp.lt.s32.totalorder %s1090_s27, %s1090_s27 }
  0x4e   :  { %p1097_p10 = por %p1096_p9, %p1095_p8 }
  0x50   :  { %p1098_p11 = pnand %p1097_p10, %p1091_p7 }
  0x52   :  { %1101 = shalt.err (!%p1098_p11)
}
  0x53   :  { %67 = dma.hbm_to_vmem [thread:$0]  %s1322_s4, 8192, %s62_s17, [#allocation11], %s1134_s1, %s1134_s1, %s1135_s15  }
  0x54   :  { %1124 = dma.done.wait [#allocation5], 64  }
  0x55   :  { %1125 = vsyncadd [#allocation5], 4294967232 }
  0x56   :  { %1126 = dma.done.wait [#allocation8], 320  }
  0x57   :  { %1127 = vsyncadd [#allocation8], 4294966976 }
  0x58   :  { %1128 = dma.done.wait [#allocation11], 16384  }
  0x59   :  { %1129 = vsyncadd [#allocation11], 4294950912  ;;  %v173_v0 = vld [vmem:[#allocation10 + $0x8] sm:$0xff]  ;;  %v175_v1 = vld [vmem:[#allocation10 + $0x18] sm:$0xff]  ;;  %v115_v25 = vlaneseq  ;;  %s1139_s4 = smov [#allocation13]  }
  0x5a   :  { %v172_v2 = vld [vmem:[#allocation10] sm:$0xff]  ;;  %v716_v3 = vpack.c.bf16 %v175_v1, %v173_v0  ;;  %v174_v4 = vld [vmem:[#allocation10 + $0x10] sm:$0xff]  ;;  %v177_v5 = vld [vmem:[#allocation10 + $0x28] sm:$0xff]  ;;  %s696_s28 = sshll.u32 %s1139_s4, 4  ;;  %s697_s28 = int_to_ptr.vmem [resolvable:$true] %s696_s28 }
  0x5b   :  { %v179_v6 = vld [vmem:[#allocation10 + $0x38] sm:$0xff]  ;;  %v718_v7 = vpack.c.bf16 %v174_v4, %v172_v2  ;;  %v176_v9 = vld [vmem:[#allocation10 + $0x20] sm:$0xff]  ;;  %v178_v10 = vld [vmem:[#allocation10 + $0x30] sm:$0xff]  ;;  %v1243_v32 = vshrl.u32 %v115_v25, 7  ;;  %s1102_s29 = scalar_lea.vmem %s697_s28, 512  ;;  %p1107_p13 = scmp.lt.s32.totalorder %s697_s28, %s697_s28 }
  0x5c   :  { %v720_v8 = vpack.c.bf16 %v179_v6, %v177_v5  ;;  %v181_v11 = vld [vmem:[#allocation10 + $0x48] sm:$0xff]  ;;  %717 = vmatprep.subr.bf16.mxu1 %v716_v3  ;;  %845 = vmatprep.subr.bf16.mxu0 %v716_v3  ;;  %v183_v12 = vld [vmem:[#allocation10 + $0x58] sm:$0xff]  ;;  %v722_v13 = vpack.c.bf16 %v178_v10, %v176_v9  ;;  %v180_v15 = vld [vmem:[#allocation10 + $0x40] sm:$0xff]  ;;  %p1103_p12 = scmp.ne.s32.totalorder %s697_s28, %s1102_s29  ;;  %p1108_p0 = scmp.lt.s32.totalorder %s1102_s29, %s1102_s29 }
  0x5d   :  { %719 = vmatpush1.bf16.msra.mxu1 %v718_v7  ;;  %847 = vmatpush1.bf16.msra.mxu0 %v718_v7  ;;  %v724_v14 = vpack.c.bf16 %v183_v12, %v181_v11  ;;  %v182_v16 = vld [vmem:[#allocation10 + $0x50] sm:$0xff]  ;;  %v185_v17 = vld [vmem:[#allocation10 + $0x68] sm:$0xff]  ;;  %v187_v18 = vld [vmem:[#allocation10 + $0x78] sm:$0xff]  ;;  %v1246_v39 = vsub.s32 1, %v1243_v32 }
  0x5e   :  { %721 = vmatprep.subr.bf16.mxu1 %v720_v8  ;;  %849 = vmatprep.subr.bf16.mxu0 %v720_v8  ;;  %v726_v19 = vpack.c.bf16 %v182_v16, %v180_v15  ;;  %v728_v20 = vpack.c.bf16 %v187_v18, %v185_v17  ;;  %v184_v21 = vld [vmem:[#allocation10 + $0x60] sm:$0xff]  ;;  %v186_v22 = vld [vmem:[#allocation10 + $0x70] sm:$0xff]  ;;  %v189_v23 = vld [vmem:[#allocation10 + $0x88] sm:$0xff]  ;;  %p1109_p1 = por %p1108_p0, %p1107_p13 }
  0x5f   :  { %v191_v24 = vld [vmem:[#allocation10 + $0x98] sm:$0xff]  ;;  %v730_v26 = vpack.c.bf16 %v186_v22, %v184_v21  ;;  %v188_v28 = vld [vmem:[#allocation10 + $0x80] sm:$0xff]  ;;  %v190_v29 = vld [vmem:[#allocation10 + $0x90] sm:$0xff] }
  0x60   :  { %v732_v27 = vpack.c.bf16 %v191_v24, %v189_v23  ;;  %v193_v30 = vld [vmem:[#allocation10 + $0xa8] sm:$0xff]  ;;  %v195_v31 = vld [vmem:[#allocation10 + $0xb8] sm:$0xff]  ;;  %v734_v33 = vpack.c.bf16 %v190_v29, %v188_v28  ;;  %v192_v35 = vld [vmem:[#allocation10 + $0xa0] sm:$0xff]  ;;  %p1110_p2 = pnand %p1109_p1, %p1103_p12 }
  0x61   :  { %723 = vmatpush1.bf16.msra.mxu1 %v722_v13  ;;  %851 = vmatpush1.bf16.msra.mxu0 %v722_v13  ;;  %v736_v34 = vpack.c.bf16 %v195_v31, %v193_v30  ;;  %v194_v36 = vld [vmem:[#allocation10 + $0xb0] sm:$0xff]  ;;  %v197_v37 = vld [vmem:[#allocation10 + $0xc8] sm:$0xff]  ;;  %v199_v38 = vld [vmem:[#allocation10 + $0xd8] sm:$0xff] }
  0x62   :  { %725 = vmatprep.subr.bf16.mxu1 %v724_v14  ;;  %853 = vmatprep.subr.bf16.mxu0 %v724_v14  ;;  %v738_v40 = vpack.c.bf16 %v194_v36, %v192_v35  ;;  %v196_v41 = vld [vmem:[#allocation10 + $0xc0] sm:$0xff]  ;;  %v740_v42 = vpack.c.bf16 %v199_v38, %v197_v37  ;;  %v198_v43 = vld [vmem:[#allocation10 + $0xd0] sm:$0xff]  ;;  %v1248_v44 = vld.sshfl [vmem:[#allocation4] sm:$0x33 pattern:$0x75316420] }
  0x63   :  { %v1250_v45 = vld [vmem:[#allocation9 + $0x8] sm:$0xff]  ;;  %v201_v46 = vld [vmem:[#allocation10 + $0xe8] sm:$0xff]  ;;  %v122_v48 = vrot.slane %v1248_v44, %v1246_v39  ;;  %v742_v50 = vpack.c.bf16 %v198_v43, %v196_v41  ;;  %v200_v54 = vld [vmem:[#allocation10 + $0xe0] sm:$0xff]  ;;  %v117_v38 = vsub.s32 0, %v1243_v32 }
  0x64   :  { %v203_v47 = vld [vmem:[#allocation10 + $0xf8] sm:$0xff]  ;;  %v1254_v49 = vld.sshfl [vmem:[#allocation7] sm:$0x33 pattern:$0x75316420]  ;;  %v202_v55 = vld [vmem:[#allocation10 + $0xf0] sm:$0xff] }
  0x65   :  { %727 = vmatpush1.bf16.msra.mxu1 %v726_v19  ;;  %855 = vmatpush1.bf16.msra.mxu0 %v726_v19  ;;  %v1257_v51 = vmul.f32 %v122_v48, %v1250_v45  ;;  %v155_v52 = vrot.slane %v1254_v49, %v1246_v39  ;;  %v744_v53 = vpack.c.bf16 %v203_v47, %v201_v46  ;;  %v205_v56 = vld [vmem:[#allocation10 + $0x108] sm:$0xff]  ;;  %v207_v57 = vld [vmem:[#allocation10 + $0x118] sm:$0xff]  ;;  %v204_v61 = vld [vmem:[#allocation10 + $0x100] sm:$0xff] }
  0x66   :  { %729 = vmatprep.subr.bf16.mxu1 %v728_v20  ;;  %857 = vmatprep.subr.bf16.mxu0 %v728_v20  ;;  %v746_v59 = vpack.c.bf16 %v202_v55, %v200_v54  ;;  %v748_v60 = vpack.c.bf16 %v207_v57, %v205_v56  ;;  %v206_v62 = vld [vmem:[#allocation10 + $0x110] sm:$0xff]  ;;  %v209_v63 = vld [vmem:[#allocation10 + $0x128] sm:$0xff]  ;;  %v211_v0 = vld [vmem:[#allocation10 + $0x138] sm:$0xff]  ;;  %v114_v48 = vcombine.high %v1248_v44, %v1248_v44 }
  0x67   :  { %368 = vmatprep.mubr.f32.mxu1 %v1257_v51  ;;  %v1263_v58 = vmul.f32 %v155_v52, %v1250_v45  ;;  %v750_v1 = vpack.c.bf16 %v206_v62, %v204_v61  ;;  %v752_v2 = vpack.c.bf16 %v211_v0, %v209_v63  ;;  %v208_v3 = vld [vmem:[#allocation10 + $0x120] sm:$0xff]  ;;  %v210_v4 = vld [vmem:[#allocation10 + $0x130] sm:$0xff]  ;;  %v213_v5 = vld [vmem:[#allocation10 + $0x148] sm:$0xff]  ;;  %v118_v52 = vrot.slane %v1248_v44, %v117_v38 }
  0x68   :  { %v215_v6 = vld [vmem:[#allocation10 + $0x158] sm:$0xff]  ;;  %v754_v7 = vpack.c.bf16 %v210_v4, %v208_v3  ;;  %v212_v9 = vld [vmem:[#allocation10 + $0x140] sm:$0xff]  ;;  %v214_v10 = vld [vmem:[#allocation10 + $0x150] sm:$0xff]  ;;  %v151_v32 = vrot.slane %v1254_v49, %v117_v38  ;;  %v130_v61 = vrot.slane %v114_v48, %v1246_v39 }
  0x69   :  { %731 = vmatpush1.bf16.msra.mxu1 %v730_v26  ;;  %859 = vmatpush1.bf16.msra.mxu0 %v730_v26  ;;  %v756_v8 = vpack.c.bf16 %v215_v6, %v213_v5  ;;  %v217_v11 = vld [vmem:[#allocation10 + $0x168] sm:$0xff]  ;;  %v219_v12 = vld [vmem:[#allocation10 + $0x178] sm:$0xff]  ;;  %v758_v13 = vpack.c.bf16 %v214_v10, %v212_v9  ;;  %v216_v15 = vld [vmem:[#allocation10 + $0x160] sm:$0xff] }
  0x6a   :  { %733 = vmatprep.subr.bf16.mxu1 %v732_v27  ;;  %861 = vmatprep.subr.bf16.mxu0 %v732_v27  ;;  %v760_v14 = vpack.c.bf16 %v219_v12, %v217_v11  ;;  %v218_v16 = vld [vmem:[#allocation10 + $0x170] sm:$0xff]  ;;  %v221_v17 = vld [vmem:[#allocation10 + $0x188] sm:$0xff]  ;;  %v223_v18 = vld [vmem:[#allocation10 + $0x198] sm:$0xff] }
  0x6b   :  { %538 = vmatprep.mubr.f32.mxu0 %v1263_v58  ;;  %v762_v19 = vpack.c.bf16 %v218_v16, %v216_v15  ;;  %v764_v20 = vpack.c.bf16 %v223_v18, %v221_v17  ;;  %v220_v21 = vld [vmem:[#allocation10 + $0x180] sm:$0xff]  ;;  %v222_v22 = vld [vmem:[#allocation10 + $0x190] sm:$0xff]  ;;  %v225_v23 = vld [vmem:[#allocation10 + $0x1a8] sm:$0xff] }
  0x6c   :  { %v227_v24 = vld [vmem:[#allocation10 + $0x1b8] sm:$0xff]  ;;  %v766_v25 = vpack.c.bf16 %v222_v22, %v220_v21  ;;  %v224_v27 = vld [vmem:[#allocation10 + $0x1a0] sm:$0xff]  ;;  %v226_v28 = vld [vmem:[#allocation10 + $0x1b0] sm:$0xff] }
  0x6d   :  { %735 = vmatpush1.bf16.msra.mxu1 %v734_v33  ;;  %863 = vmatpush1.bf16.msra.mxu0 %v734_v33  ;;  %v768_v26 = vpack.c.bf16 %v227_v24, %v225_v23  ;;  %v229_v29 = vld [vmem:[#allocation10 + $0x1c8] sm:$0xff]  ;;  %v231_v30 = vld [vmem:[#allocation10 + $0x1d8] sm:$0xff]  ;;  %v770_v31 = vpack.c.bf16 %v226_v28, %v224_v27  ;;  %v230_v35 = vld [vmem:[#allocation10 + $0x1d0] sm:$0xff] }
  0x6e   :  { %737 = vmatprep.subr.bf16.mxu1 %v736_v34  ;;  %865 = vmatprep.subr.bf16.mxu0 %v736_v34  ;;  %v772_v33 = vpack.c.bf16 %v231_v30, %v229_v29  ;;  %v228_v34 = vld [vmem:[#allocation10 + $0x1c0] sm:$0xff]  ;;  %v233_v36 = vld [vmem:[#allocation10 + $0x1e8] sm:$0xff]  ;;  %v235_v37 = vld [vmem:[#allocation10 + $0x1f8] sm:$0xff] }
  0x6f   :  { %v776_v41 = vpack.c.bf16 %v235_v37, %v233_v36  ;;  %v234_v43 = vld [vmem:[#allocation10 + $0x1f0] sm:$0xff]  ;;  %v237_v46 = vld [vmem:[#allocation12 + $0x8] sm:$0xff]  ;;  %v239_v47 = vld [vmem:[#allocation12 + $0x18] sm:$0xff] }
  0x70   :  { %v104_v54 = vld [vmem:[#allocation9] sm:$0xff]  ;;  %v780_v55 = vpack.c.bf16 %v239_v47, %v237_v46  ;;  %v236_v56 = vld [vmem:[#allocation12] sm:$0xff]  ;;  %v245_v5 = vld [vmem:[#allocation12 + $0x48] sm:$0xff] }
  0x71   :  { %739 = vmatpush1.bf16.msra.mxu1 %v738_v40  ;;  %867 = vmatpush1.bf16.msra.mxu0 %v738_v40  ;;  %v774_v40 = vpack.c.bf16 %v230_v35, %v228_v34  ;;  %v238_v57 = vld [vmem:[#allocation12 + $0x10] sm:$0xff]  ;;  %v1275_v63 = vmul.f32 %v118_v52, %v104_v54  ;;  %v1277_v44 = vmul.f32 %v151_v32, %v104_v54  ;;  %v240_v3 = vld [vmem:[#allocation12 + $0x20] sm:$0xff]  ;;  %v247_v6 = vld [vmem:[#allocation12 + $0x58] sm:$0xff] }
  0x72   :  { %741 = vmatprep.subr.bf16.mxu1 %v740_v42  ;;  %869 = vmatprep.subr.bf16.mxu0 %v740_v42  ;;  %v232_v42 = vld [vmem:[#allocation10 + $0x1e0] sm:$0xff]  ;;  %v242_v4 = vld [vmem:[#allocation12 + $0x30] sm:$0xff]  ;;  %v788_v11 = vpack.c.bf16 %v247_v6, %v245_v5  ;;  %v251_v15 = vld [vmem:[#allocation12 + $0x78] sm:$0xff] }
  0x73   :  { %v786_v10 = vpack.c.bf16 %v242_v4, %v240_v3  ;;  %v244_v12 = vld [vmem:[#allocation12 + $0x40] sm:$0xff]  ;;  %v250_v18 = vld [vmem:[#allocation12 + $0x70] sm:$0xff]  ;;  %v261_v30 = vld [vmem:[#allocation12 + $0xc8] sm:$0xff] }
  0x74   :  { %v248_v17 = vld [vmem:[#allocation12 + $0x60] sm:$0xff]  ;;  %v254_v24 = vld [vmem:[#allocation12 + $0x90] sm:$0xff]  ;;  %v265_v36 = vld [vmem:[#allocation12 + $0xe8] sm:$0xff] }
  0x75   :  { %743 = vmatpush1.bf16.msra.mxu1 %v742_v50  ;;  %871 = vmatpush1.bf16.msra.mxu0 %v742_v50  ;;  %v147_v50 = vcombine.high %v1254_v49, %v1254_v49  ;;  %v126_v49 = vrot.slane %v114_v48, %v117_v38  ;;  %v794_v21 = vpack.c.bf16 %v250_v18, %v248_v17  ;;  %v252_v23 = vld [vmem:[#allocation12 + $0x80] sm:$0xff]  ;;  %v262_v35 = vld [vmem:[#allocation12 + $0xd0] sm:$0xff]  ;;  %v267_v37 = vld [vmem:[#allocation12 + $0xf8] sm:$0xff] }
  0x76   :  { %745 = vmatprep.subr.bf16.mxu1 %v744_v53  ;;  %873 = vmatprep.subr.bf16.mxu0 %v744_v53  ;;  %v778_v53 = vpack.c.bf16 %v234_v43, %v232_v42  ;;  %v798_v27 = vpack.c.bf16 %v254_v24, %v252_v23  ;;  %v256_v29 = vld [vmem:[#allocation12 + $0xa0] sm:$0xff]  ;;  %v266_v42 = vld [vmem:[#allocation12 + $0xf0] sm:$0xff]  ;;  %v269_v43 = vld [vmem:[#allocation12 + $0x108] sm:$0xff] }
  0x77   :  { %v163_v62 = vrot.slane %v147_v50, %v1246_v39  ;;  %v159_v0 = vrot.slane %v147_v50, %v117_v38  ;;  %v260_v34 = vld [vmem:[#allocation12 + $0xc0] sm:$0xff]  ;;  %v271_v46 = vld [vmem:[#allocation12 + $0x118] sm:$0xff]  ;;  %v270_v52 = vld [vmem:[#allocation12 + $0x110] sm:$0xff] }
  0x78   :  { %v806_v38 = vpack.c.bf16 %v262_v35, %v260_v34  ;;  %v812_v48 = vpack.c.bf16 %v271_v46, %v269_v43  ;;  %v268_v50 = vld [vmem:[#allocation12 + $0x100] sm:$0xff]  ;;  %v273_v32 = vld [vmem:[#allocation12 + $0x128] sm:$0xff]  ;;  %v282_v6 = vld [vmem:[#allocation12 + $0x170] sm:$0xff] }
  0x79   :  { %747 = vmatpush1.bf16.msra.mxu1 %v746_v59  ;;  %875 = vmatpush1.bf16.msra.mxu0 %v746_v59  ;;  %v241_v59 = vld [vmem:[#allocation12 + $0x28] sm:$0xff]  ;;  %v1283_v39 = vmul.f32 %v163_v62, %v1250_v45  ;;  %v1289_v9 = vmul.f32 %v159_v0, %v104_v54  ;;  %v278_v0 = vld [vmem:[#allocation12 + $0x150] sm:$0xff]  ;;  %v280_v5 = vld [vmem:[#allocation12 + $0x160] sm:$0xff] }
  0x7a   :  { %749 = vmatprep.subr.bf16.mxu1 %v748_v60  ;;  %877 = vmatprep.subr.bf16.mxu0 %v748_v60  ;;  %v243_v60 = vld [vmem:[#allocation12 + $0x38] sm:$0xff] }
  0x7d   :  { %751 = vmatpush1.bf16.msra.mxu1 %v750_v1  ;;  %879 = vmatpush1.bf16.msra.mxu0 %v750_v1  ;;  %v782_v1 = vpack.c.bf16 %v238_v57, %v236_v56  ;;  %v272_v56 = vld [vmem:[#allocation12 + $0x120] sm:$0xff]  ;;  %v274_v57 = vld [vmem:[#allocation12 + $0x130] sm:$0xff] }
  0x7e   :  { %753 = vmatprep.subr.bf16.mxu1 %v752_v2  ;;  %881 = vmatprep.subr.bf16.mxu0 %v752_v2  ;;  %v784_v2 = vpack.c.bf16 %v243_v60, %v241_v59  ;;  %v277_v59 = vld [vmem:[#allocation12 + $0x148] sm:$0xff]  ;;  %v279_v60 = vld [vmem:[#allocation12 + $0x158] sm:$0xff] }
  0x7f   :  { %v820_v62 = vpack.c.bf16 %v279_v60, %v277_v59 }
  0x81   :  { %755 = vmatpush1.bf16.msra.mxu1 %v754_v7  ;;  %883 = vmatpush1.bf16.msra.mxu0 %v754_v7  ;;  %v1280_v7 = vmul.f32 %v130_v61, %v1250_v45  ;;  %v818_v61 = vpack.c.bf16 %v274_v57, %v272_v56 }
  0x82   :  { %757 = vmatprep.subr.bf16.mxu1 %v756_v8  ;;  %885 = vmatprep.subr.bf16.mxu0 %v756_v8  ;;  %v1287_v8 = vmul.f32 %v126_v49, %v104_v54  ;;  %v814_v54 = vpack.c.bf16 %v270_v52, %v268_v50  ;;  %v276_v49 = vld [vmem:[#allocation12 + $0x140] sm:$0xff] }
  0x83   :  { %v822_v3 = vpack.c.bf16 %v278_v0, %v276_v49 }
  0x85   :  { %759 = vmatpush1.bf16.msra.mxu1 %v758_v13  ;;  %887 = vmatpush1.bf16.msra.mxu0 %v758_v13  ;;  %v246_v13 = vld [vmem:[#allocation12 + $0x50] sm:$0xff] }
  0x86   :  { %761 = vmatprep.subr.bf16.mxu1 %v760_v14  ;;  %889 = vmatprep.subr.bf16.mxu0 %v760_v14  ;;  %v249_v14 = vld [vmem:[#allocation12 + $0x68] sm:$0xff]  ;;  %v790_v45 = vpack.c.bf16 %v246_v13, %v244_v12  ;;  %v826_v12 = vpack.c.bf16 %v282_v6, %v280_v5 }
  0x87   :  { %v792_v16 = vpack.c.bf16 %v251_v15, %v249_v14  ;;  %v284_v14 = vld [vmem:[#allocation12 + $0x180] sm:$0xff]  ;;  %v286_v15 = vld [vmem:[#allocation12 + $0x190] sm:$0xff] }
  0x88   :  { %v830_v17 = vpack.c.bf16 %v286_v15, %v284_v14 }
  0x89   :  { %763 = vmatpush1.bf16.msra.mxu1 %v762_v19  ;;  %891 = vmatpush1.bf16.msra.mxu0 %v762_v19  ;;  %v253_v19 = vld [vmem:[#allocation12 + $0x88] sm:$0xff] }
  0x8a   :  { %765 = vmatprep.subr.bf16.mxu1 %v764_v20  ;;  %893 = vmatprep.subr.bf16.mxu0 %v764_v20  ;;  %v255_v20 = vld [vmem:[#allocation12 + $0x98] sm:$0xff] }
  0x8b   :  { %v796_v22 = vpack.c.bf16 %v255_v20, %v253_v19  ;;  %v288_v19 = vld [vmem:[#allocation12 + $0x1a0] sm:$0xff]  ;;  %v290_v20 = vld [vmem:[#allocation12 + $0x1b0] sm:$0xff] }
  0x8c   :  { %v834_v23 = vpack.c.bf16 %v290_v20, %v288_v19 }
  0x8d   :  { %767 = vmatpush1.bf16.msra.mxu1 %v766_v25  ;;  %895 = vmatpush1.bf16.msra.mxu0 %v766_v25  ;;  %v257_v25 = vld [vmem:[#allocation12 + $0xa8] sm:$0xff] }
  0x8e   :  { %769 = vmatprep.subr.bf16.mxu1 %v768_v26  ;;  %897 = vmatprep.subr.bf16.mxu0 %v768_v26  ;;  %v259_v26 = vld [vmem:[#allocation12 + $0xb8] sm:$0xff] }
  0x8f   :  { %v800_v28 = vpack.c.bf16 %v259_v26, %v257_v25  ;;  %v292_v25 = vld [vmem:[#allocation12 + $0x1c0] sm:$0xff]  ;;  %v294_v26 = vld [vmem:[#allocation12 + $0x1d0] sm:$0xff] }
  0x91   :  { %771 = vmatpush1.bf16.msra.mxu1 %v770_v31  ;;  %899 = vmatpush1.bf16.msra.mxu0 %v770_v31 }
  0x92   :  { %773 = vmatprep.subr.bf16.mxu1 %v772_v33  ;;  %901 = vmatprep.subr.bf16.mxu0 %v772_v33 }
  0x95   :  { %775 = vmatpush1.bf16.msra.mxu1 %v774_v40  ;;  %903 = vmatpush1.bf16.msra.mxu0 %v774_v40  ;;  %v808_v40 = vpack.c.bf16 %v267_v37, %v265_v36 }
  0x96   :  { %777 = vmatprep.subr.bf16.mxu1 %v776_v41  ;;  %905 = vmatprep.subr.bf16.mxu0 %v776_v41  ;;  %v264_v41 = vld [vmem:[#allocation12 + $0xe0] sm:$0xff] }
  0x97   :  { %v810_v47 = vpack.c.bf16 %v266_v42, %v264_v41 }
  0x99   :  { %779 = vmatpush1.bf16.msra.mxu1 %v778_v53  ;;  %907 = vmatpush1.bf16.msra.mxu0 %v778_v53  ;;  %v275_v53 = vld [vmem:[#allocation12 + $0x138] sm:$0xff] }
  0x9a   :  { %781 = vmatprep.subr.bf16.mxu1 %v780_v55  ;;  %909 = vmatprep.subr.bf16.mxu0 %v780_v55  ;;  %v816_v55 = vpack.c.bf16 %v275_v53, %v273_v32 }
  0x9c   :  { %369 = vmatmul.mubr.f32.vlgmr.msra.gmra.mrb[0].mxu1 %v1275_v63  ;;  %539 = vmatmul.mubr.f32.vlgmr.msra.gmra.mrb[0].mxu0 %v1277_v44 }
  0x9d   :  { %783 = vmatpush1.bf16.msra.mxu1 %v782_v1  ;;  %911 = vmatpush1.bf16.msra.mxu0 %v782_v1  ;;  %v281_v1 = vld [vmem:[#allocation12 + $0x168] sm:$0xff] }
  0x9e   :  { %785 = vmatprep.subr.bf16.mxu1 %v784_v2  ;;  %913 = vmatprep.subr.bf16.mxu0 %v784_v2  ;;  %v283_v2 = vld [vmem:[#allocation12 + $0x178] sm:$0xff] }
  0x9f   :  { %374 = vmatprep.mubr.f32.mxu1 %v1280_v7  ;;  %544 = vmatprep.mubr.f32.mxu0 %v1283_v39  ;;  %v824_v4 = vpack.c.bf16 %v283_v2, %v281_v1 }
  0xa0   :  { %375 = vmatmul.mubr.f32.gmra.mrb[2].mxu1 %v1287_v8  ;;  %545 = vmatmul.mubr.f32.gmra.mrb[2].mxu0 %v1289_v9 }
  0xa1   :  { %787 = vmatpush1.bf16.msra.mxu1 %v786_v10  ;;  %915 = vmatpush1.bf16.msra.mxu0 %v786_v10  ;;  %v285_v10 = vld [vmem:[#allocation12 + $0x188] sm:$0xff] }
  0xa2   :  { %789 = vmatprep.subr.bf16.mxu1 %v788_v11  ;;  %917 = vmatprep.subr.bf16.mxu0 %v788_v11  ;;  %v287_v11 = vld [vmem:[#allocation12 + $0x198] sm:$0xff] }
  0xa3   :  { %445 = vmatprep.mubr.f32.mxu1 %v1263_v58  ;;  %615 = vmatprep.mubr.f32.mxu0 %v1257_v51  ;;  %v258_v58 = vld [vmem:[#allocation12 + $0xb0] sm:$0xff]  ;;  %v263_v51 = vld [vmem:[#allocation12 + $0xd8] sm:$0xff]  ;;  %v828_v13 = vpack.c.bf16 %v287_v11, %v285_v10 }
  0xa4   :  { %v802_v31 = vpack.c.bf16 %v258_v58, %v256_v29  ;;  %v804_v33 = vpack.c.bf16 %v263_v51, %v261_v30  ;;  %v838_v29 = vpack.c.bf16 %v294_v26, %v292_v25  ;;  %v296_v30 = vld [vmem:[#allocation12 + $0x1e0] sm:$0xff]  ;;  %v298_v51 = vld [vmem:[#allocation12 + $0x1f0] sm:$0xff] }
  0xa5   :  { %791 = vmatpush1.bf16.msra.mxu1 %v790_v45  ;;  %919 = vmatpush1.bf16.msra.mxu0 %v790_v45  ;;  %v289_v45 = vld [vmem:[#allocation12 + $0x1a8] sm:$0xff] }
  0xa6   :  { %793 = vmatprep.subr.bf16.mxu1 %v792_v16  ;;  %921 = vmatprep.subr.bf16.mxu0 %v792_v16  ;;  %v291_v16 = vld [vmem:[#allocation12 + $0x1b8] sm:$0xff] }
  0xa7   :  { %v832_v18 = vpack.c.bf16 %v291_v16, %v289_v45 }
  0xa9   :  { %795 = vmatpush1.bf16.msra.mxu1 %v794_v21  ;;  %923 = vmatpush1.bf16.msra.mxu0 %v794_v21  ;;  %v293_v21 = vld [vmem:[#allocation12 + $0x1c8] sm:$0xff] }
  0xaa   :  { %797 = vmatprep.subr.bf16.mxu1 %v796_v22  ;;  %925 = vmatprep.subr.bf16.mxu0 %v796_v22  ;;  %v295_v22 = vld [vmem:[#allocation12 + $0x1d8] sm:$0xff] }
  0xab   :  { %v836_v24 = vpack.c.bf16 %v295_v22, %v293_v21 }
  0xad   :  { %799 = vmatpush1.bf16.msra.mxu1 %v798_v27  ;;  %927 = vmatpush1.bf16.msra.mxu0 %v798_v27  ;;  %v297_v27 = vld [vmem:[#allocation12 + $0x1e8] sm:$0xff] }
  0xae   :  { %801 = vmatprep.subr.bf16.mxu1 %v800_v28  ;;  %929 = vmatprep.subr.bf16.mxu0 %v800_v28  ;;  %v299_v28 = vld [vmem:[#allocation12 + $0x1f8] sm:$0xff] }
  0xaf   :  { %v840_v58 = vpack.c.bf16 %v299_v28, %v297_v27 }
  0xb1   :  { %803 = vmatpush1.bf16.msra.mxu1 %v802_v31  ;;  %931 = vmatpush1.bf16.msra.mxu0 %v802_v31  ;;  %v842_v31 = vpack.c.bf16 %v298_v51, %v296_v30 }
  0xb2   :  { %805 = vmatprep.subr.bf16.mxu1 %v804_v33  ;;  %933 = vmatprep.subr.bf16.mxu0 %v804_v33 }
  0xb5   :  { %807 = vmatpush1.bf16.msra.mxu1 %v806_v38  ;;  %935 = vmatpush1.bf16.msra.mxu0 %v806_v38 }
  0xb6   :  { %809 = vmatprep.subr.bf16.mxu1 %v808_v40  ;;  %937 = vmatprep.subr.bf16.mxu0 %v808_v40 }
  0xb9   :  { %811 = vmatpush1.bf16.msra.mxu1 %v810_v47  ;;  %939 = vmatpush1.bf16.msra.mxu0 %v810_v47 }
  0xba   :  { %813 = vmatprep.subr.bf16.mxu1 %v812_v48  ;;  %941 = vmatprep.subr.bf16.mxu0 %v812_v48 }
  0xbd   :  { %815 = vmatpush1.bf16.msra.mxu1 %v814_v54  ;;  %943 = vmatpush1.bf16.msra.mxu0 %v814_v54 }
  0xbe   :  { %817 = vmatprep.subr.bf16.mxu1 %v816_v55  ;;  %945 = vmatprep.subr.bf16.mxu0 %v816_v55 }
  0xc1   :  { %819 = vmatpush1.bf16.msra.mxu1 %v818_v61  ;;  %947 = vmatpush1.bf16.msra.mxu0 %v818_v61 }
  0xc2   :  { %821 = vmatprep.subr.bf16.mxu1 %v820_v62  ;;  %949 = vmatprep.subr.bf16.mxu0 %v820_v62 }
  0xc5   :  { %823 = vmatpush1.bf16.msra.mxu1 %v822_v3  ;;  %951 = vmatpush1.bf16.msra.mxu0 %v822_v3 }
  0xc6   :  { %825 = vmatprep.subr.bf16.mxu1 %v824_v4  ;;  %953 = vmatprep.subr.bf16.mxu0 %v824_v4 }
  0xc9   :  { %827 = vmatpush1.bf16.msra.mxu1 %v826_v12  ;;  %955 = vmatpush1.bf16.msra.mxu0 %v826_v12 }
  0xca   :  { %829 = vmatprep.subr.bf16.mxu1 %v828_v13  ;;  %957 = vmatprep.subr.bf16.mxu0 %v828_v13 }
  0xcd   :  { %831 = vmatpush1.bf16.msra.mxu1 %v830_v17  ;;  %959 = vmatpush1.bf16.msra.mxu0 %v830_v17 }
  0xce   :  { %833 = vmatprep.subr.bf16.mxu1 %v832_v18  ;;  %961 = vmatprep.subr.bf16.mxu0 %v832_v18 }
  0xd1   :  { %835 = vmatpush1.bf16.msra.mxu1 %v834_v23  ;;  %963 = vmatpush1.bf16.msra.mxu0 %v834_v23 }
  0xd2   :  { %837 = vmatprep.subr.bf16.mxu1 %v836_v24  ;;  %965 = vmatprep.subr.bf16.mxu0 %v836_v24 }
  0xd5   :  { %839 = vmatpush1.bf16.msra.mxu1 %v838_v29  ;;  %967 = vmatpush1.bf16.msra.mxu0 %v838_v29 }
  0xd6   :  { %841 = vmatprep.subr.bf16.mxu1 %v840_v58  ;;  %969 = vmatprep.subr.bf16.mxu0 %v840_v58 }
  0xd9   :  { %843 = vmatpush1.bf16.msra.mxu1 %v842_v31  ;;  %971 = vmatpush1.bf16.msra.mxu0 %v842_v31 }
  0xdc   :  { %446 = vmatmul.mubr.f32.vlgmr.msra.gmra.mrb[4].mxu1 %v1277_v44  ;;  %616 = vmatmul.mubr.f32.vlgmr.msra.gmra.mrb[0].mxu0 %v1275_v63 }
  0xdd   :  { %451 = vmatprep.mubr.f32.mxu1 %v1283_v39  ;;  %621 = vmatprep.mubr.f32.mxu0 %v1280_v7 }
  0xe0   :  { %452 = vmatmul.mubr.f32.gmra.mrb[6].mxu1 %v1289_v9  ;;  %622 = vmatmul.mubr.f32.gmra.mrb[2].mxu0 %v1287_v8 }
 0x16f   :  { %v370_v33 = vpop.f32.mrb[0].mxu1 }
 0x170   :  { %v372_v34 = vpop.f32.mrb[1].mxu1 }
 0x173   :  { %v376_v35 = vpop.f32.mrb[2].mxu1 }
 0x174   :  { %v378_v36 = vpop.f32.mrb[3].mxu1 }
 0x1af   :  { %v447_v37 = vpop.f32.mrb[4].mxu1  ;;  %v617_v38 = vpop.f32.mrb[0].mxu0 }
 0x1b0   :  { %v458_v40 = vsub.f32 %v370_v33, %v447_v37  ;;  %v449_v41 = vpop.f32.mrb[5].mxu1  ;;  %v619_v42 = vpop.f32.mrb[1].mxu0  ;;  %v651_v63 = vmul.f32 %v617_v38, %v617_v38 }
 0x1b1   :  { %v459_v44 = vsub.f32 %v372_v34, %v449_v41  ;;  %v652_v39 = vmul.f32 %v619_v42, %v619_v42 }
 0x1b2   :  { %v647_v43 = vmul.f32 %v458_v40, %v458_v40 }
 0x1b3   :  { %v648_v46 = vmul.f32 %v459_v44, %v459_v44  ;;  %v453_v47 = vpop.f32.mrb[6].mxu1  ;;  %v623_v7 = vpop.f32.mrb[2].mxu0 }
 0x1b4   :  { %v655_v48 = vadd.f32 %v651_v63, %v647_v43  ;;  %v460_v9 = vsub.f32 %v376_v35, %v453_v47  ;;  %v455_v50 = vpop.f32.mrb[7].mxu1  ;;  %v625_v8 = vpop.f32.mrb[3].mxu0  ;;  %v653_v54 = vmul.f32 %v623_v7, %v623_v7 }
 0x1b5   :  { %v656_v52 = vadd.f32 %v652_v39, %v648_v46  ;;  %v461_v32 = vsub.f32 %v378_v36, %v455_v50  ;;  %v654_v56 = vmul.f32 %v625_v8, %v625_v8 }
 0x1b6   :  { %984 = vrsqrt.f32 %v655_v48  ;;  %v649_v53 = vmul.f32 %v460_v9, %v460_v9  ;;  %vm661_vm0 = vcmp.eq.f32.partialorder %v655_v48, inf  ;;  %v664_v49 = vand.u32 2147483648, %v655_v48 }
 0x1b7   :  { %986 = vrsqrt.f32 %v656_v52  ;;  %v650_v55 = vmul.f32 %v461_v32, %v461_v32  ;;  %vm663_vm1 = vcmp.eq.f32.partialorder %v655_v48, 0.0  ;;  %vm668_vm2 = vcmp.eq.f32.partialorder %v656_v52, inf }
 0x1b8   :  { %v657_v57 = vadd.f32 %v653_v54, %v649_v53  ;;  %v671_v2 = vand.u32 2147483648, %v656_v52  ;;  %vm670_vm3 = vcmp.eq.f32.partialorder %v656_v52, 0.0 }
 0x1b9   :  { %v658_v59 = vadd.f32 %v654_v56, %v650_v55 }
 0x1ba   :  { %988 = vrsqrt.f32 %v657_v57  ;;  %vm675_vm4 = vcmp.eq.f32.partialorder %v657_v57, inf  ;;  %v678_v12 = vand.u32 2147483648, %v657_v57  ;;  %vm677_vm5 = vcmp.eq.f32.partialorder %v657_v57, 0.0 }
 0x1bb   :  { %990 = vrsqrt.f32 %v658_v59  ;;  %vm682_vm6 = vcmp.eq.f32.partialorder %v658_v59, inf  ;;  %v685_v15 = vand.u32 2147483648, %v658_v59  ;;  %vm684_vm7 = vcmp.eq.f32.partialorder %v658_v59, 0.0 }
 0x1c0   :  { %v985_v60 = vpop.eup %984 }
 0x1c1   :  { %v987_v61 = vpop.eup %986  ;;  %v660_v62 = vmul.f32 %v985_v60, %v655_v48 }
 0x1c2   :  { %v667_v0 = vmul.f32 %v987_v61, %v656_v52 }
 0x1c3   :  { %v662_v1 = vsel %vm661_vm0, %v655_v48, %v660_v62 }
 0x1c4   :  { %v989_v3 = vpop.eup %988  ;;  %v665_v4 = vsel %vm663_vm1, %v664_v49, %v662_v1  ;;  %v669_v5 = vsel %vm668_vm2, %v656_v52, %v667_v0 }
 0x1c5   :  { %v991_v6 = vpop.eup %990  ;;  %v672_v10 = vsel %vm670_vm3, %v671_v2, %v669_v5  ;;  %v674_v11 = vmul.f32 %v989_v3, %v657_v57  ;;  %687 = vst [vmem:[#allocation13] sm:$0xff] %v665_v4 }
 0x1c6   :  { %v681_v13 = vmul.f32 %v991_v6, %v658_v59  ;;  %688 = vst [vmem:[#allocation13 + $0x8] sm:$0xff] %v672_v10 }
 0x1c7   :  { %v676_v14 = vsel %vm675_vm4, %v657_v57, %v674_v11 }
 0x1c8   :  { %v679_v45 = vsel %vm677_vm5, %v678_v12, %v676_v14  ;;  %v683_v16 = vsel %vm682_vm6, %v658_v59, %v681_v13 }
 0x1c9   :  { %v686_v17 = vsel %vm684_vm7, %v685_v15, %v683_v16  ;;  %689 = vst [vmem:[#allocation13 + $0x10] sm:$0xff] %v679_v45 }
 0x1ca   :  { %690 = vst [vmem:[#allocation13 + $0x18] sm:$0xff] %v686_v17 }
 0x1cb   :  { %1113 = shalt.err (!%p1110_p2)
}
 0x1cc   :  { %s1114_s30 = scalar_lea.hbm %s1323_s5, 512 }
 0x1cd   :  { %p1115_p3 = scmp.ne.s32.totalorder %s1323_s5, %s1114_s30  ;;  %p1118_p4 = scmp.lt.u32.totalorder %s1114_s30, %s1323_s5 }
 0x1cf   :  { %p1120_p5 = pnand %p1118_p4, %p1115_p3 }
 0x1d1   :  { %1123 = shalt.err (!%p1120_p5)
}
 0x1d2   :  { %702 = dma.vmem_to_hbm [thread:$0]  %s697_s28, 512, %s1323_s5, [#allocation6], %s1134_s1, %s1134_s1, %s1135_s15  }
 0x1d3   :  { %1130 = dma.done.wait [#allocation6], 512  }
 0x1d4   :  { %1131 = vsyncadd [#allocation6], 4294966784 }
 0x1d5   :  { %706 = vsyncpa [#allocation5], 1 }
 0x1d6   :  { %707 = vsyncpa [#allocation8], 1 }
 0x1d7   :  { %708 = vsyncpa [#allocation11], 1 }
 0x1d8   :  { %709 = vsyncpa [#allocation6], 1 }

</bundles_post_ra>
